<compile_context>
chip_gen: v6e
topology: v6e:2x2x1
jax: 0.10.0
libtpu: 0.0.40
codegen_flags: <defaults>
</compile_context>

<pallas_src>
import jax
import jax.numpy as jnp
from jax.experimental import pallas as pl
from jax.experimental.pallas import tpu as pltpu

LANES = 128            # vreg lane width; output last dim kept lane-dense
MAX_TILE_ROWS = 4096   # (4096, 128) f32 tile = 2 MiB per buffer
# Minimum sublane tile height per element size (f32 / bf16 / int8-fp8).
_SUBLANE_MIN = {4: 8, 2: 16, 1: 32}


def _fma_kernel(wb_ref, x_ref, o_ref):
    # wb_ref: SMEM (2,) = [weight, bias] scalars; x_ref/o_ref: (tile_rows, 128) VMEM.
    o_ref[...] = x_ref[...] * wb_ref[0] + wb_ref[1]


def _round_up(v, m):
    return ((v + m - 1) // m) * m


def linear_forward(x, weight, bias):
    """nn.Linear(1, 1): y = x @ W^T + b, computed as a streaming FMA.

    x: (N, 1), weight: (1, 1), bias: (1,)  ->  (N, 1)
    """
    n, in_f = x.shape
    out_f = weight.shape[0]
    assert in_f == 1 and out_f == 1, "LinearRegression spec is nn.Linear(1, 1)"

    w = weight.reshape(())
    b = bias.reshape(())
    total = n * in_f
    sublane = _SUBLANE_MIN[jnp.dtype(x.dtype).itemsize]

    # Small-N fast path: below one minimal (sublane, 128) tile the kernel
    # launch + reshape overhead dominates; a fused XLA elementwise op wins.
    if total < sublane * LANES:
        return (x * w + b).astype(x.dtype)

    rows = pl.cdiv(total, LANES)
    flat = x.reshape(-1)
    if total % LANES != 0:
        # Pad only to the next lane multiple (<128 extra elements).
        flat = jnp.pad(flat, (0, rows * LANES - total))
    slab = flat.reshape(rows, LANES)  # free metadata op when lane-aligned

    if rows <= 2 * sublane:
        # One block covering the whole array (full-array dims are always a
        # legal block shape, even when not a multiple of 8).
        tile_rows = rows
    else:
        # >= 2 blocks so ("parallel",) can shard across v7x's two TCs, capped
        # at ~2 MiB per tile to amortize per-step overhead while staying well
        # inside scoped-VMEM defaults on v5e/v6e/v7x when double-buffered.
        tile_rows = min(MAX_TILE_ROWS, _round_up(pl.cdiv(rows, 2), sublane))

    grid = (pl.cdiv(rows, tile_rows),)
    wb = jnp.stack([w, b]).astype(x.dtype)  # [weight, bias] scalars -> SMEM

    out_slab = pl.pallas_call(
        _fma_kernel,
        out_shape=jax.ShapeDtypeStruct((rows, LANES), x.dtype),
        grid=grid,
        in_specs=[
            pl.BlockSpec(memory_space=pltpu.SMEM),               # [w, b]
            pl.BlockSpec((tile_rows, LANES), lambda i: (i, 0)),  # x slab tile
        ],
        out_specs=pl.BlockSpec((tile_rows, LANES), lambda i: (i, 0)),
        input_output_aliases={1: 0},            # out slab reuses in slab buffer
        compiler_params=pltpu.CompilerParams(
            dimension_semantics=("parallel",),  # megacore sharding on v7x
        ),
    )(wb, slab)

    flat_out = out_slab.reshape(-1)
    if total % LANES != 0:
        flat_out = flat_out[:total]
    return flat_out.reshape(n, out_f)


if __name__ == "__main__":
    key = jax.random.PRNGKey(0)
    k_x, k_w, k_b = jax.random.split(key, 3)

    # Module shapes: nn.Linear(1, 1) -> weight (1, 1), bias (1,)
    in_features, out_features = 1, 1
    bound = 1.0 / (in_features ** 0.5)
    weight = jax.random.uniform(
        k_w, (out_features, in_features), jnp.float32, -bound, bound)
    bias = jax.random.uniform(
        k_b, (out_features,), jnp.float32, -bound, bound)

    # Three regimes:
    #  - batch=8   : tiny demo batch -> plain-JAX fast path
    #  - batch=3072: lane-aligned, zero-copy slab, 2-block grid (partial last)
    #  - batch=1030: unaligned -> small pad to next 128 multiple, 1 block
    x_small = jax.random.normal(k_x, (8, in_features), jnp.float32)
    x_mid = jax.random.normal(k_x, (3072, in_features), jnp.float32)
    x_odd = jax.random.normal(k_x, (1030, in_features), jnp.float32)

    # Materialize references first (nn.Linear semantics).
    ref_small = x_small @ weight.T + bias
    ref_mid = x_mid @ weight.T + bias
    ref_odd = x_odd @ weight.T + bias
    jax.block_until_ready((ref_small, ref_mid, ref_odd))

    y_small = linear_forward(x_small, weight, bias)
    y_mid = linear_forward(x_mid, weight, bias)
    y_odd = linear_forward(x_odd, weight, bias)
    jax.block_until_ready((y_small, y_mid, y_odd))

    assert y_small.shape == (8, out_features)
    assert y_mid.shape == (3072, out_features)
    assert y_odd.shape == (1030, out_features)
    assert jnp.allclose(y_small, ref_small, atol=1e-6, rtol=1e-6)
    assert jnp.allclose(y_mid, ref_mid, atol=1e-6, rtol=1e-6)
    assert jnp.allclose(y_odd, ref_odd, atol=1e-6, rtol=1e-6)

    print("KERNEL_OK")
</pallas_src>

<mosaic_0001>
module attributes {stable_mosaic.version = 11 : i64} {
  func.func @_fma_kernel(%arg0: i32, %arg1: memref<2xf32, #tpu.memory_space<smem>>, %arg2: memref<16x128xf32, #tpu.memory_space<vmem>>, %arg3: memref<16x128xf32, #tpu.memory_space<vmem>>) attributes {dimension_semantics = [#tpu.dimension_semantics<parallel>], iteration_bounds = array<i64: 2>, scalar_prefetch = 0 : i64, scratch_operands = 0 : i64, tpu.core_type = #tpu.core_type<tc>, window_params = [{transform_indices = @transform_0, window_bounds = array<i64: 2>}, {transform_indices = @transform_1, window_bounds = array<i64: 16, 128>}, {transform_indices = @transform_2, window_bounds = array<i64: 16, 128>}]} {
    %c0 = arith.constant 0 : index
    %c0_0 = arith.constant 0 : index
    %0 = vector.load %arg2[%c0, %c0_0] : memref<16x128xf32, #tpu.memory_space<vmem>>, vector<16x128xf32>
    %c0_1 = arith.constant 0 : index
    %1 = memref.load %arg1[%c0_1] : memref<2xf32, #tpu.memory_space<smem>>
    %2 = vector.broadcast %1 : f32 to vector<16x128xf32>
    %3 = arith.mulf %0, %2 : vector<16x128xf32>
    %c1 = arith.constant 1 : index
    %4 = memref.load %arg1[%c1] : memref<2xf32, #tpu.memory_space<smem>>
    %5 = vector.broadcast %4 : f32 to vector<16x128xf32>
    %6 = arith.addf %3, %5 : vector<16x128xf32>
    %c0_2 = arith.constant 0 : index
    %c0_3 = arith.constant 0 : index
    %7 = vector.load %arg3[%c0_2, %c0_3] : memref<16x128xf32, #tpu.memory_space<vmem>>, vector<16x128xf32>
    tpu.vector_store %arg3[%c0_2, %c0_3], %6 {strides = array<i32>} : memref<16x128xf32, #tpu.memory_space<vmem>>, vector<16x128xf32>,
    return
  }
  func.func @transform_0(%arg0: i32) -> i32 {
    %c0_i32 = arith.constant 0 : i32
    %c0_i32_0 = arith.constant 0 : i32
    return %c0_i32 : i32
  }
  func.func @transform_1(%arg0: i32) -> (i32, i32) {
    %c0_i32 = arith.constant 0 : i32
    %c0_i32_0 = arith.constant 0 : i32
    return %arg0, %c0_i32 : i32, i32
  }
  func.func @transform_2(%arg0: i32) -> (i32, i32) {
    %c0_i32 = arith.constant 0 : i32
    %c0_i32_0 = arith.constant 0 : i32
    return %arg0, %c0_i32 : i32, i32
  }
}

</mosaic_0001>

<bundles_post_ra>
// kernel: tpu_custom_call.1
= control target key start
LH: loop header
LB: loop body
LE: loop exit
PB: predicated region body
PF: predicated region fallthrough
CT: control target
= control target key end

     0   :  { %7 = vsyncpa [#allocation5], 0  ;;  %s716_s0 = inlined_call_operand.vmem [shape: f32[2], index: 0, kind: input, shape index: {}]   ;;  %s717_s1 = inlined_call_operand.hbm [shape: f32[24,128], index: 1, kind: input, shape index: {}, may-alias: {1,2}]   ;;  %s718_s2 = inlined_call_operand.hbm [shape: f32[24,128], index: 2, kind: output, shape index: {}, may-alias: {1,2}]  }
   0x1   :  { %8 = vsyncpa [#allocation3], 0 }
   0x2   :  { %10 = vsyncpa [#allocation3 + $0x1], 0 }
   0x3   :  { %11 = vsyncpa [#allocation4], 0 }
   0x4   :  { %13 = vsyncpa [#allocation4 + $0x1], 0  ;;  %s523_s9 = smov 0   ;;  %s525_s10 = smov 0  }
   0x5   :  { %s527_s11 = smov 0   ;;  %s529_s12 = smov 0  }
   0x6 LB: > { %s544_s13 = sadd.s32 4294967295, %s499_s12   ;;  %s309_s14 = sadd.s32 4294967294, %s499_s12   ;;  %s499_s12 = sphi %s529_s12, %s733_s12   ;;  %s495_s11 = sphi %s527_s11, %s732_s11   ;;  %s491_s10 = sphi %s525_s10, %s731_s10   ;;  %s487_s9 = sphi %s523_s9, %s730_s9  }
   0x7   : > { %s548_s15 = sadd.s32 1, %s499_s12   ;;  %s47_s16 = sadd.s32 1, %s495_s11 }
   0x8   : > { %s44_s17 = ssub.s32 %s499_s12, %s548_s15  ;;  %p54_p0 = scmp.ne.s32.totalorder %s495_s11, %s491_s10 }
   0x9   : > { %p45_p1 = scmp.eq.s32.totalorder %s44_s17, 0  ;;  %p55_p2 = scmp.eq.s32.totalorder %s499_s12, 0 }
   0xa   : > { %p60_p3 = scmp.ne.s32.totalorder %s491_s10, %s487_s9  ;;  %p61_p4 = scmp.eq.s32.totalorder %s544_s13, 0 }
   0xb   : > { %s560_s18 = scalar_select %p45_p1, %s495_s11, %s47_s16  }
   0xc   : > { %p562_p5 = por %p55_p2, %p54_p0  ;;  %p568_p6 = por %p61_p4, %p60_p3 }
   0xd   : > { %p84_p7 = scmp.eq.s32.totalorder %s544_s13, 1  ;;  %p90_p8 = scmp.eq.s32.totalorder %s309_s14, 1 }
   0xe   : > { %s722_s20 = scalar_select %p568_p6, 1, 0 }
   0xf   : > { %p310_p9 = scmp.ge.s32.totalorder %s499_s12, 1  ;;  %p97_p10 = scmp.lt.s32.totalorder %s499_s12, 3 }
  0x10   : > { %p575_p11 = por %p84_p7, %p54_p0  ;;  %p579_p12 = por %p90_p8, %p60_p3 }
  0x11   : > { %p583_p13 = pnand %p310_p9, %p97_p10  ;;  %s110_s26 = sshll.u32 %s716_s0, 4  ;;  %s111_s26 = int_to_ptr.vmem [resolvable:$true] %s110_s26 }
  0x12   : > { %s723_s21 = scalar_select %p575_p11, 1, 0 }
  0x13   : > { %s724_s22 = scalar_select %p579_p12, 1, 0 }
  0x14   : > { %p342_p1 = pneg %p583_p13  ;;  %s390_s27 = scalar_lea.vmem %s111_s26, 16 }
  0x15   : > { %p391_p2 = scmp.ne.s32.totalorder %s111_s26, %s390_s27  ;;  %p398_p12 = scmp.lt.s32.totalorder %s111_s26, %s111_s26 }
  0x16   : > { %p343_p0 = pnand %p342_p1, %p61_p4  ;;  %p399_p9 = scmp.lt.s32.totalorder %s390_s27, %s390_s27 }
  0x18   : > { %p392_p3 = pneg %p343_p0  ;;  %p400_p10 = por %p399_p9, %p398_p12 }
  0x1a   : > { %p393_p7 = pnand %p392_p3, %p391_p2 }
  0x1c   : > { %p394_p8 = pneg %p393_p7 }
  0x1e   : > { %p401_p11 = pnand %p400_p10, %p394_p8 }
  0x20   : > { %404 = shalt.err (!%p401_p11)
}
  0x21   : > { %s501_s28 = smov [#allocation2]   ;;  %p720_p6 = scmp.ge.s32.totalorder %s499_s12, 2 }
  0x22   : > { %345 = dma.vmem_to_smem (!%p343_p0), %s111_s26, 16, %s501_s28, [#allocation5]  }
  0x23   : > { %117 = sbr.rel (%p720_p6) target bundleno = 72 (0x48), region = 20 }
  0x28   : > { %120 = sbr.rel (!%p562_p5) target bundleno = 72 (0x48), region = 24  ;;  %s121_s29 = sand.u32 (%p562_p5), 1, %s495_s11  }
  0x29   : > { %s314_s30 = sshll.u32 (%p562_p5), %s499_s12, 1  ;;  %s313_s3 = sshll.u32 (%p562_p5), %s121_s29, 4 }
  0x2a   : > { %s127_s4 = ssub.s32 (%p562_p5), 3, %s314_s30  ;;  %s604_s7 = scalar_lea.sflag (%p562_p5), [#allocation3], %s121_s29 }
  0x2b   : > { %p128_p1 = scmp.lt.s32.totalorder (%p562_p5), %s127_s4, 2  ;;  %s125_s8 = scalar_lea.vmem (%p562_p5), [#allocation6], %s313_s3 }
  0x2d   : > { %s735_s4 = smov (!%p128_p1, %s127_s4), 2 }
  0x2e   : > { %s601_s5 = sshll.u32 %s735_s4, 7 }
  0x2f   : > { %s132_s6 = ssub.s32 256, %s601_s5 }
  0x30   : > { %133 = vsyncadd %s604_s7, %s132_s6  ;;  %p316_p5 = scmp.ne.s32.totalorder %s601_s5, 0  ;;  %s334_s14 = sshll.u32 %s499_s12, 8 }
  0x31   : > { %s612_s19 = scalar_lea.hbm %s717_s1, %s334_s14  ;;  %s138_s24 = sshll.u32 %s125_s8, 4  ;;  %s614_s24 = int_to_ptr.vmem [resolvable:$true] %s138_s24 }
  0x32   : > { %s405_s25 = scalar_lea.hbm %s612_s19, %s601_s5  ;;  %s409_s28 = scalar_lea.hbm %s717_s1, 384 }
  0x33   : > { %p406_p11 = scmp.ne.s32.totalorder %s612_s19, %s405_s25  ;;  %p410_p2 = scmp.lt.s32.totalorder %s612_s19, %s717_s1 }
  0x34   : > { %p411_p3 = scmp.lt.s32.totalorder %s409_s28, %s405_s25 }
  0x35   : > { %p407_p12 = pnand %p406_p11, %p316_p5 }
  0x36   : > { %p412_p7 = por %p411_p3, %p410_p2 }
  0x37   : > { %p408_p0 = pneg %p407_p12 }
  0x39   : > { %p413_p8 = pnand %p412_p7, %p408_p0 }
  0x3b   : > { %416 = shalt.err (!%p413_p8)
}
  0x3c   : > { %s417_s3 = scalar_lea.vmem %s614_s24, %s601_s5  ;;  %s502_s4 = smov [#allocation6]  }
  0x3d   : > { %p418_p9 = scmp.ne.s32.totalorder %s614_s24, %s417_s3  ;;  %s421_s6 = sshll.u32 %s502_s4, 4  ;;  %s422_s6 = int_to_ptr.vmem [resolvable:$false] %s421_s6 }
  0x3e   : > { %s423_s8 = scalar_lea.vmem %s422_s6, 512  ;;  %p424_p11 = scmp.lt.s32.totalorder %s614_s24, %s422_s6 }
  0x3f   : > { %p419_p10 = pnand %p418_p9, %p316_p5  ;;  %p425_p12 = scmp.lt.s32.totalorder %s423_s8, %s417_s3 }
  0x41   : > { %p420_p1 = pneg %p419_p10  ;;  %p426_p6 = por %p425_p12, %p424_p11 }
  0x43   : > { %p427_p2 = pnand %p426_p6, %p420_p1 }
  0x45   : > { %430 = shalt.err (!%p427_p2)
}
  0x46   : > { %s503_s14 = smov 128   ;;  %s504_s16 = smov 8  }
  0x47   : > { %144 = dma.hbm_to_vmem [thread:$0]  (%p316_p5), %s612_s19, %s601_s5, %s614_s24, %s604_s7, %s503_s14, %s503_s14, %s504_s16  }
  0x48 PF: > { %150 = sbr.rel (%p583_p13) target bundleno = 123 (0x7b), region = 28 }
  0x4d   : > { %474 = dma.done.wait (%p61_p4), [#allocation5], 16  }
  0x4e   : > { %476 = vsyncadd (%p61_p4), [#allocation5], 4294967280  ;;  %s647_s17 = sand.u32 1, %s491_s10   ;;  %p726_p6 = scmp.ne.s32.totalorder %s722_s20, 0 }
  0x4f   : > { %s322_s25 = sshll.u32 %s647_s17, 4  ;;  %s157_s26 = scalar_lea.sflag [#allocation3], %s647_s17 }
  0x50   : > { %s160_s5 = scalar_lea.vmem [#allocation6], %s322_s25 }
  0x51   : > { %478 = dma.done.wait (%p726_p6), %s157_s26, 256  }
  0x52   : > { %480 = vsyncadd (%p726_p6), %s157_s26, 4294967040 }
  0x53   : > { %165 = sfence }
  0x54   : > { %s194_s23 = sld [smem:[#allocation2]]  ;;  %v192_v0 = vld [vmem:[%s160_s5] sm:$0xff]  ;;  %v193_v1 = vld [vmem:[%s160_s5 + $0x8] sm:$0xff]  ;;  %s181_s19 = scalar_lea.vmem [#allocation7], %s322_s25 }
  0x55   : > { %s324_s7 = sld [smem:[#allocation2 + $0x1]]  ;;  %s205_s24 = scalar_lea.sflag [#allocation4], %s647_s17 }
  0x56   : > { %p727_p4 = scmp.ne.s32.totalorder %s723_s21, 0 }
  0x57   : > { %s326_s20 = sshll.u32 (%p727_p4), %s544_s13, 1 }
  0x58   : > { %s213_s27 = ssub.s32 (%p727_p4), 3, %s326_s20 }
  0x59   : > { %p214_p13 = scmp.lt.s32.totalorder (%p727_p4), %s213_s27, 2 }
  0x5a   : > { %v195_v2 = vstv %s194_s23 }
  0x5b   : > { %v196_v3 = vmul.f32 %v195_v2, %v192_v0  ;;  %v199_v4 = vstv %s324_s7  ;;  %v197_v5 = vmul.f32 %v195_v2, %v193_v1  ;;  %211 = sbr.rel (!%p727_p4) target bundleno = 123 (0x7b), region = 40 }
  0x5d   : > { %v200_v6 = vadd.f32 %v199_v4, %v196_v3  ;;  %v201_v7 = vadd.f32 %v199_v4, %v197_v5 }
  0x5f   : > { %202 = vst [vmem:[%s181_s19] sm:$0xff] %v200_v6  ;;  %203 = vst [vmem:[%s181_s19 + $0x8] sm:$0xff] %v201_v7 }
  0x60   : > { %s737_s27 = smov (!%p214_p13, %s213_s27), 2 }
  0x61   : > { %s659_s28 = sshll.u32 %s737_s27, 7 }
  0x62   : > { %s218_s29 = ssub.s32 256, %s659_s28 }
  0x63   : > { %219 = vsyncadd %s205_s24, %s218_s29  ;;  %p328_p5 = scmp.ne.s32.totalorder %s659_s28, 0  ;;  %s335_s30 = sshll.u32 %s544_s13, 8 }
  0x64   : > { %s669_s4 = scalar_lea.hbm %s718_s2, %s335_s30  ;;  %s224_s6 = sshll.u32 %s181_s19, 4  ;;  %s671_s6 = int_to_ptr.vmem [resolvable:$true] %s224_s6 }
  0x65   : > { %s431_s8 = scalar_lea.vmem %s671_s6, %s659_s28  ;;  %s505_s14 = smov [#allocation7]  }
  0x66   : > { %p432_p0 = scmp.ne.s32.totalorder %s671_s6, %s431_s8  ;;  %s435_s16 = sshll.u32 %s505_s14, 4  ;;  %s436_s16 = int_to_ptr.vmem [resolvable:$false] %s435_s16 }
  0x67   : > { %s437_s13 = scalar_lea.vmem %s436_s16, 512  ;;  %p438_p8 = scmp.lt.s32.totalorder %s671_s6, %s436_s16 }
  0x68   : > { %p433_p3 = pnand %p432_p0, %p328_p5  ;;  %p439_p9 = scmp.lt.s32.totalorder %s437_s13, %s431_s8 }
  0x6a   : > { %p434_p7 = pneg %p433_p3  ;;  %p440_p10 = por %p439_p9, %p438_p8 }
  0x6c   : > { %p441_p1 = pnand %p440_p10, %p434_p7 }
  0x6e   : > { %444 = shalt.err (!%p441_p1)
}
  0x6f   : > { %s445_s25 = scalar_lea.hbm %s669_s4, %s659_s28  ;;  %s449_s23 = scalar_lea.hbm %s718_s2, 384 }
  0x70   : > { %p446_p11 = scmp.ne.s32.totalorder %s669_s4, %s445_s25  ;;  %p450_p6 = scmp.lt.s32.totalorder %s669_s4, %s718_s2 }
  0x71   : > { %p451_p4 = scmp.lt.s32.totalorder %s449_s23, %s445_s25 }
  0x72   : > { %p447_p12 = pnand %p446_p11, %p328_p5 }
  0x73   : > { %p452_p13 = por %p451_p4, %p450_p6 }
  0x74   : > { %p448_p2 = pneg %p447_p12 }
  0x76   : > { %p453_p0 = pnand %p452_p13, %p448_p2 }
  0x78   : > { %456 = shalt.err (!%p453_p0)
}
  0x79   : > { %s506_s20 = smov 128   ;;  %s507_s27 = smov 8  }
  0x7a   : > { %230 = dma.vmem_to_hbm [thread:$0]  (%p328_p5), %s671_s6, %s659_s28, %s669_s4, %s205_s24, %s506_s20, %s506_s20, %s507_s27  }
  0x7b PF: > { %s239_s29 = sand.u32 1, %s487_s9   ;;  %p728_p3 = scmp.ne.s32.totalorder %s724_s22, 0 }
  0x7c   : > { %p729_p7 = scmp.ge.s32.totalorder %s499_s12, 2  ;;  %s240_s30 = scalar_lea.sflag [#allocation4], %s239_s29 }
  0x7e   : > { %p347_p8 = pnand %p729_p7, %p728_p3 }
  0x80   : > { %p348_p9 = pneg %p347_p8 }
  0x82   : > { %482 = dma.done.wait (%p348_p9), %s240_s30, 256  }
  0x83   : > { %484 = vsyncadd (%p348_p9), %s240_s30, 4294967040  ;;  %p16_p10 = scmp.ge.s32.totalorder %s548_s15, 4   ;;  %s730_s9 = smov %s491_s10 }
  0x84   : > { %s731_s10 = smov %s495_s11  ;;  %s732_s11 = smov %s560_s18 }
  0x85   : > { %s733_s12 = smov %s548_s15  ;;  %18 = sbr.rel (!%p16_p10) target bundleno = 6 (0x6), region = 78 }
  0x8a   :  { %245 = vsyncpa [#allocation3], 1 }
  0x8b   :  { %247 = vsyncpa [#allocation3 + $0x1], 1 }
  0x8c   :  { %248 = vsyncpa [#allocation4], 1 }
  0x8d   :  { %250 = vsyncpa [#allocation4 + $0x1], 1 }
  0x8e   :  { %251 = vsyncpa [#allocation5], 1 }
  0x8f   :  { %253 = vsyncpa [#allocation5 + $0x1], 1 }

</bundles_post_ra>
